<compile_context>
chip_gen: v5e
topology: v5e:2x2
jax: 0.10.0
libtpu: 0.0.40
codegen_flags: <defaults>
</compile_context>

<pallas_src>
import functools

import numpy as np

import jax
import jax.numpy as jnp
from jax import lax
from jax.experimental import pallas as pl
from jax.experimental.pallas import tpu as pltpu


def _round_up(a, b):
    return ((a + b - 1) // b) * b


def _mkmmd_tile_kernel(bw_ref, xi_ref, xjt_ref, sqi_ref, sqj_ref, out_ref, gram_acc,
                       *, num1, num2, n_total, tm, tn, num_kernels, multiplier):
    i = pl.program_id(0)
    j = pl.program_id(1)
    k = pl.program_id(2)
    nk = pl.num_programs(2)

    # Fresh per-i output partial (out block is resident across j, k).
    @pl.when(jnp.logical_and(j == 0, k == 0))
    def _():
        out_ref[...] = jnp.zeros_like(out_ref)

    # Fresh Gram accumulator for this (i, j) tile.
    @pl.when(k == 0)
    def _():
        gram_acc[...] = jnp.zeros_like(gram_acc)

    # Gram block accumulated over the feature dim on the MXU.  RHS tile arrives
    # pre-transposed as (TK, TN) so no in-kernel transpose is needed.
    gram_acc[...] += jnp.dot(xi_ref[...], xjt_ref[...],
                             preferred_element_type=jnp.float32)

    @pl.when(k == nk - 1)
    def _():
        # Pairwise squared distances for this tile (clamped against rounding).
        dists = jnp.maximum(sqi_ref[...] + sqj_ref[...] - 2.0 * gram_acc[...], 0.0)

        # Multi-kernel RBF ladder: per-element work is multiply + exp only; the
        # divides are scalar-only (hoisted out of the N^2 work).
        bw0 = bw_ref[0, 0]
        total = jnp.zeros_like(dists)
        for kk in range(num_kernels):
            scale = -1.0 / (bw0 * float(multiplier ** kk))   # scalar
            total = total + jnp.exp(dists * scale)

        # Signed block weights: +1/num1 for x1 rows, -1/num2 for x2 rows, 0 for
        # padding.  One weighted reduction replaces four masked block means.
        w_pos = (1.0 / num1) if num1 > 0 else 0.0
        w_neg = (-1.0 / num2) if num2 > 0 else 0.0
        gi = i * tm + lax.broadcasted_iota(jnp.int32, (tm, 1), 0)
        gj = j * tn + lax.broadcasted_iota(jnp.int32, (1, tn), 1)
        wi = jnp.where(gi < num1, w_pos,
                       jnp.where(gi < n_total, w_neg, 0.0)).astype(jnp.float32)
        wj = jnp.where(gj < num1, w_pos,
                       jnp.where(gj < n_total, w_neg, 0.0)).astype(jnp.float32)

        contrib = jnp.sum(total * wi * wj) * (1.0 / float(num_kernels))
        out_ref[...] += contrib


@functools.partial(jax.jit, static_argnames=("num_kernels", "multiplier", "sigma"))
def multi_kernel_mmd_loss(x1, x2, num_kernels=5, multiplier=2.0, sigma=None):
    """Pallas implementation of MultiKernelMaxMeanDiscrepancyLoss.forward."""
    num1, num2 = int(x1.shape[0]), int(x2.shape[0])
    if num1 == 0 and num2 == 0:
        return jnp.float32(0.0)

    x = jnp.concatenate([x1, x2], axis=0)        # keep native dtype (bf16 stays bf16)
    n, d = int(x.shape[0]), int(x.shape[1])

    # Bandwidth (mean pairwise squared distance) computed analytically, O(N*D).
    xf = x.astype(jnp.float32)
    if sigma is None:
        centered = xf - jnp.mean(xf, axis=0, keepdims=True)
        bw = (2.0 * float(n)) * jnp.sum(centered * centered) / float(n * n - n)
    else:
        bw = jnp.float32(sigma)
    bw0 = jnp.asarray(bw * float(multiplier ** (-(num_kernels // 2))),
                      jnp.float32).reshape(1, 1)

    # Tile selection.  Small N: one padded tile (grid (1,1,1)); larger N: 256x256
    # pairwise tiles with up-to-512-wide feature chunks.
    tm = min(_round_up(n, 8), 256)
    tn = tm
    n_pad = _round_up(n, tm)
    d_pad = _round_up(d, 128)
    if d_pad % 512 == 0:
        tk = 512
    elif d_pad % 256 == 0:
        tk = 256
    else:
        tk = 128
    g_i, g_j, g_k = n_pad // tm, n_pad // tn, d_pad // tk

    x_pad = jnp.pad(x, ((0, n_pad - n), (0, d_pad - d)))
    x_pad_t = x_pad.T                                     # (D_pad, N_pad) RHS
    sq = jnp.sum(jnp.square(x_pad.astype(jnp.float32)), axis=1)
    sq_row = sq.reshape(n_pad, 1)
    sq_col = sq.reshape(1, n_pad)

    kernel = functools.partial(
        _mkmmd_tile_kernel,
        num1=num1, num2=num2, n_total=n, tm=tm, tn=tn,
        num_kernels=int(num_kernels), multiplier=float(multiplier),
    )

    partials = pl.pallas_call(
        kernel,
        out_shape=jax.ShapeDtypeStruct((g_i, 8, 128), jnp.float32),
        grid=(g_i, g_j, g_k),
        in_specs=[
            pl.BlockSpec(memory_space=pltpu.MemorySpace.SMEM),     # bw0 scalar
            pl.BlockSpec((tm, tk), lambda i, j, k: (i, k)),        # x rows   (i-tile)
            pl.BlockSpec((tk, tn), lambda i, j, k: (k, j)),        # x^T cols (j-tile)
            pl.BlockSpec((tm, 1), lambda i, j, k: (i, 0)),         # row ||x||^2
            pl.BlockSpec((1, tn), lambda i, j, k: (0, j)),         # col ||x||^2
        ],
        out_specs=pl.BlockSpec((1, 8, 128), lambda i, j, k: (i, 0, 0)),
        scratch_shapes=[pltpu.VMEM((tm, tn), jnp.float32)],
        compiler_params=pltpu.CompilerParams(
            dimension_semantics=("parallel", "arbitrary", "arbitrary"),
        ),
    )(bw0, x_pad, x_pad_t, sq_row, sq_col)

    return jnp.sum(partials[:, 0, 0])


def _reference(x1, x2, num_kernels=5, multiplier=2.0, sigma=None):
    """NumPy float64 reference mirroring the PyTorch module."""
    x1 = np.asarray(x1, np.float64)
    x2 = np.asarray(x2, np.float64)
    x = np.concatenate([x1, x2], axis=0)
    n = x.shape[0]
    sq = np.sum(x * x, axis=1, keepdims=True)
    d = np.maximum(sq + sq.T - 2.0 * (x @ x.T), 0.0)
    np.fill_diagonal(d, 0.0)
    bw = d.sum() / (n * n - n) if sigma is None else float(sigma)
    bw = bw * multiplier ** (-(num_kernels // 2))
    kern = sum(np.exp(-d / (bw * multiplier ** k)) for k in range(num_kernels)) / num_kernels
    n1 = x1.shape[0]
    if n1 == 0 or x2.shape[0] == 0:
        return kern.mean()
    k11 = kern[:n1, :n1].mean()
    k12 = kern[:n1, n1:].mean()
    k21 = kern[n1:, :n1].mean()
    k22 = kern[n1:, n1:].mean()
    return k11 - k12 - k21 + k22


if __name__ == "__main__":
    key = jax.random.PRNGKey(0)
    k1, k2, k3, k4 = jax.random.split(key, 4)

    # Small case (single padded tile): pooled hidden states, batch 4 vs 6, hidden 32.
    x1 = jax.random.normal(k1, (4, 32), dtype=jnp.float32)
    x2 = jax.random.normal(k2, (6, 32), dtype=jnp.float32) + 0.5

    out_small = jax.block_until_ready(multi_kernel_mmd_loss(x1, x2))
    ref_small = _reference(np.asarray(x1), np.asarray(x2))
    assert np.allclose(float(out_small), ref_small, rtol=1e-4, atol=1e-6), (float(out_small), ref_small)

    # Fixed-sigma branch.
    out_sig = jax.block_until_ready(multi_kernel_mmd_loss(x1, x2, sigma=4.0))
    ref_sig = _reference(np.asarray(x1), np.asarray(x2), sigma=4.0)
    assert np.allclose(float(out_sig), ref_sig, rtol=1e-4, atol=1e-6), (float(out_sig), ref_sig)

    # Larger case exercising the full tiled grid (3 x 3 x 5) with row & feature padding.
    y1 = jax.random.normal(k3, (300, 600), dtype=jnp.float32)
    y2 = jax.random.normal(k4, (260, 600), dtype=jnp.float32) + 0.5
    out_big = jax.block_until_ready(multi_kernel_mmd_loss(y1, y2))
    ref_big = _reference(np.asarray(y1), np.asarray(y2))
    assert np.allclose(float(out_big), ref_big, rtol=5e-3, atol=1e-4), (float(out_big), ref_big)

    print("KERNEL_OK")
</pallas_src>

<mosaic_0001>
module attributes {stable_mosaic.version = 11 : i64} {
  func.func @_mkmmd_tile_kernel(%arg0: i32, %arg1: i32, %arg2: i32, %arg3: memref<1x1xf32, #tpu.memory_space<smem>>, %arg4: memref<16x128xf32, #tpu.memory_space<vmem>>, %arg5: memref<128x16xf32, #tpu.memory_space<vmem>>, %arg6: memref<16x1xf32, #tpu.memory_space<vmem>>, %arg7: memref<1x16xf32, #tpu.memory_space<vmem>>, %arg8: memref<1x8x128xf32, #tpu.memory_space<vmem>>, %arg9: memref<16x16xf32, #tpu.memory_space<vmem>>) attributes {dimension_semantics = [#tpu.dimension_semantics<parallel>, #tpu.dimension_semantics<arbitrary>, #tpu.dimension_semantics<arbitrary>], iteration_bounds = array<i64: 1, 1, 1>, scalar_prefetch = 0 : i64, scratch_operands = 1 : i64, tpu.core_type = #tpu.core_type<tc>, window_params = [{transform_indices = @transform_0, window_bounds = array<i64: 1, 1>}, {transform_indices = @transform_1, window_bounds = array<i64: 16, 128>}, {transform_indices = @transform_2, window_bounds = array<i64: 128, 16>}, {transform_indices = @transform_3, window_bounds = array<i64: 16, 1>}, {transform_indices = @transform_4, window_bounds = array<i64: 1, 16>}, {transform_indices = @transform_5, window_bounds = array<i64: 1, 8, 128>}]} {
    %c0_i32 = arith.constant 0 : i32
    %0 = arith.cmpi eq, %arg1, %c0_i32 : i32
    %c0_i32_0 = arith.constant 0 : i32
    %1 = arith.cmpi eq, %arg2, %c0_i32_0 : i32
    %2 = arith.andi %0, %1 : i1
    %3 = arith.extui %2 : i1 to i32
    %c0_i32_1 = arith.constant 0 : i32
    %4 = arith.cmpi ne, %3, %c0_i32_1 : i32
    scf.if %4 {
      %cst_13 = arith.constant 0.000000e+00 : f32
      %17 = vector.broadcast %cst_13 : f32 to vector<1x8x128xf32>
      %c0_14 = arith.constant 0 : index
      %c0_15 = arith.constant 0 : index
      %c0_16 = arith.constant 0 : index
      %18 = vector.load %arg8[%c0_14, %c0_15, %c0_16] : memref<1x8x128xf32, #tpu.memory_space<vmem>>, vector<1x8x128xf32>
      tpu.vector_store %arg8[%c0_14, %c0_15, %c0_16], %17 {strides = array<i32>} : memref<1x8x128xf32, #tpu.memory_space<vmem>>, vector<1x8x128xf32>,
    } else {
    }
    %c0_i32_2 = arith.constant 0 : i32
    %5 = arith.cmpi eq, %arg2, %c0_i32_2 : i32
    %6 = arith.extui %5 : i1 to i32
    %c0_i32_3 = arith.constant 0 : i32
    %7 = arith.cmpi ne, %6, %c0_i32_3 : i32
    scf.if %7 {
      %cst_13 = arith.constant 0.000000e+00 : f32
      %17 = vector.broadcast %cst_13 : f32 to vector<16x16xf32>
      %c0_14 = arith.constant 0 : index
      %c0_15 = arith.constant 0 : index
      %18 = vector.load %arg9[%c0_14, %c0_15] : memref<16x16xf32, #tpu.memory_space<vmem>>, vector<16x16xf32>
      tpu.vector_store %arg9[%c0_14, %c0_15], %17 {strides = array<i32>} : memref<16x16xf32, #tpu.memory_space<vmem>>, vector<16x16xf32>,
    } else {
    }
    %c0 = arith.constant 0 : index
    %c0_4 = arith.constant 0 : index
    %8 = vector.load %arg9[%c0, %c0_4] : memref<16x16xf32, #tpu.memory_space<vmem>>, vector<16x16xf32>
    %c0_5 = arith.constant 0 : index
    %c0_6 = arith.constant 0 : index
    %9 = vector.load %arg4[%c0_5, %c0_6] : memref<16x128xf32, #tpu.memory_space<vmem>>, vector<16x128xf32>
    %c0_7 = arith.constant 0 : index
    %c0_8 = arith.constant 0 : index
    %10 = vector.load %arg5[%c0_7, %c0_8] : memref<128x16xf32, #tpu.memory_space<vmem>>, vector<128x16xf32>
    %cst = arith.constant dense<0.000000e+00> : vector<16x16xf32>
    %11 = tpu.matmul %9, %10, %cst {dimension_numbers = #tpu.dot_dimension_numbers<[1], [0], [0], [1], [0, 0, 1, 1], [], []>} : vector<16x128xf32>, vector<128x16xf32>, vector<16x16xf32> -> vector<16x16xf32>
    %12 = arith.addf %8, %11 : vector<16x16xf32>
    %c0_9 = arith.constant 0 : index
    %c0_10 = arith.constant 0 : index
    %13 = vector.load %arg9[%c0_9, %c0_10] : memref<16x16xf32, #tpu.memory_space<vmem>>, vector<16x16xf32>
    tpu.vector_store %arg9[%c0_9, %c0_10], %12 {strides = array<i32>} : memref<16x16xf32, #tpu.memory_space<vmem>>, vector<16x16xf32>,
    %c0_i32_11 = arith.constant 0 : i32
    %14 = arith.cmpi eq, %arg2, %c0_i32_11 : i32
    %15 = arith.extui %14 : i1 to i32
    %c0_i32_12 = arith.constant 0 : i32
    %16 = arith.cmpi ne, %15, %c0_i32_12 : i32
    scf.if %16 {
      %c0_13 = arith.constant 0 : index
      %c0_14 = arith.constant 0 : index
      %17 = vector.load %arg6[%c0_13, %c0_14] : memref<16x1xf32, #tpu.memory_space<vmem>>, vector<16x1xf32>
      %c0_15 = arith.constant 0 : index
      %c0_16 = arith.constant 0 : index
      %18 = vector.load %arg7[%c0_15, %c0_16] : memref<1x16xf32, #tpu.memory_space<vmem>>, vector<1x16xf32>
      %19 = vector.broadcast %17 : vector<16x1xf32> to vector<16x16xf32>
      %20 = vector.broadcast %18 : vector<1x16xf32> to vector<16x16xf32>
      %21 = arith.addf %19, %20 : vector<16x16xf32>
      %c0_17 = arith.constant 0 : index
      %c0_18 = arith.constant 0 : index
      %22 = vector.load %arg9[%c0_17, %c0_18] : memref<16x16xf32, #tpu.memory_space<vmem>>, vector<16x16xf32>
      %cst_19 = arith.constant 2.000000e+00 : f32
      %23 = vector.broadcast %cst_19 : f32 to vector<16x16xf32>
      %24 = arith.mulf %23, %22 : vector<16x16xf32>
      %25 = arith.subf %21, %24 : vector<16x16xf32>
      %cst_20 = arith.constant 0.000000e+00 : f32
      %26 = vector.broadcast %cst_20 : f32 to vector<16x16xf32>
      %27 = arith.maximumf %25, %26 : vector<16x16xf32>
      %c0_21 = arith.constant 0 : index
      %c0_22 = arith.constant 0 : index
      %28 = memref.load %arg3[%c0_21, %c0_22] : memref<1x1xf32, #tpu.memory_space<smem>>
      %cst_23 = arith.constant 0.000000e+00 : f32
      %29 = vector.broadcast %cst_23 : f32 to vector<16x16xf32>
      %cst_24 = arith.constant 1.000000e+00 : f32
      %30 = arith.mulf %28, %cst_24 : f32
      %cst_25 = arith.constant -1.000000e+00 : f32
      %31 = arith.divf %cst_25, %30 : f32
      %32 = vector.broadcast %31 : f32 to vector<16x16xf32>
      %33 = arith.mulf %27, %32 : vector<16x16xf32>
      %34 = math.exp %33 : vector<16x16xf32>
      %35 = arith.addf %29, %34 : vector<16x16xf32>
      %cst_26 = arith.constant 2.000000e+00 : f32
      %36 = arith.mulf %28, %cst_26 : f32
      %cst_27 = arith.constant -1.000000e+00 : f32
      %37 = arith.divf %cst_27, %36 : f32
      %38 = vector.broadcast %37 : f32 to vector<16x16xf32>
      %39 = arith.mulf %27, %38 : vector<16x16xf32>
      %40 = math.exp %39 : vector<16x16xf32>
      %41 = arith.addf %35, %40 : vector<16x16xf32>
      %cst_28 = arith.constant 4.000000e+00 : f32
      %42 = arith.mulf %28, %cst_28 : f32
      %cst_29 = arith.constant -1.000000e+00 : f32
      %43 = arith.divf %cst_29, %42 : f32
      %44 = vector.broadcast %43 : f32 to vector<16x16xf32>
      %45 = arith.mulf %27, %44 : vector<16x16xf32>
      %46 = math.exp %45 : vector<16x16xf32>
      %47 = arith.addf %41, %46 : vector<16x16xf32>
      %cst_30 = arith.constant 8.000000e+00 : f32
      %48 = arith.mulf %28, %cst_30 : f32
      %cst_31 = arith.constant -1.000000e+00 : f32
      %49 = arith.divf %cst_31, %48 : f32
      %50 = vector.broadcast %49 : f32 to vector<16x16xf32>
      %51 = arith.mulf %27, %50 : vector<16x16xf32>
      %52 = math.exp %51 : vector<16x16xf32>
      %53 = arith.addf %47, %52 : vector<16x16xf32>
      %cst_32 = arith.constant 1.600000e+01 : f32
      %54 = arith.mulf %28, %cst_32 : f32
      %cst_33 = arith.constant -1.000000e+00 : f32
      %55 = arith.divf %cst_33, %54 : f32
      %56 = vector.broadcast %55 : f32 to vector<16x16xf32>
      %57 = arith.mulf %27, %56 : vector<16x16xf32>
      %58 = math.exp %57 : vector<16x16xf32>
      %59 = arith.addf %53, %58 : vector<16x16xf32>
      %c16_i32 = arith.constant 16 : i32
      %60 = arith.muli %arg0, %c16_i32 : i32
      %61 = tpu.iota {dimensions = array<i32: 0>} : vector<16x1xi32>
      %62 = vector.broadcast %60 : i32 to vector<16x1xi32>
      %63 = arith.addi %62, %61 : vector<16x1xi32>
      %c16_i32_34 = arith.constant 16 : i32
      %64 = arith.muli %arg1, %c16_i32_34 : i32
      %65 = tpu.iota {dimensions = array<i32: 1>} : vector<1x16xi32>
      %66 = vector.broadcast %64 : i32 to vector<1x16xi32>
      %67 = arith.addi %66, %65 : vector<1x16xi32>
      %c4_i32 = arith.constant 4 : i32
      %68 = vector.broadcast %c4_i32 : i32 to vector<16x1xi32>
      %69 = arith.cmpi slt, %63, %68 : vector<16x1xi32>
      %c10_i32 = arith.constant 10 : i32
      %70 = vector.broadcast %c10_i32 : i32 to vector<16x1xi32>
      %71 = arith.cmpi slt, %63, %70 : vector<16x1xi32>
      %cst_35 = arith.constant -0.166666672 : f32
      %cst_36 = arith.constant 0.000000e+00 : f32
      %72 = vector.broadcast %cst_35 : f32 to vector<16x1xf32>
      %73 = vector.broadcast %cst_36 : f32 to vector<16x1xf32>
      %74 = arith.select %71, %72, %73 : vector<16x1xi1>, vector<16x1xf32>
      %cst_37 = arith.constant 2.500000e-01 : f32
      %75 = vector.broadcast %cst_37 : f32 to vector<16x1xf32>
      %76 = arith.select %69, %75, %74 : vector<16x1xi1>, vector<16x1xf32>
      %c4_i32_38 = arith.constant 4 : i32
      %77 = vector.broadcast %c4_i32_38 : i32 to vector<1x16xi32>
      %78 = arith.cmpi slt, %67, %77 : vector<1x16xi32>
      %c10_i32_39 = arith.constant 10 : i32
      %79 = vector.broadcast %c10_i32_39 : i32 to vector<1x16xi32>
      %80 = arith.cmpi slt, %67, %79 : vector<1x16xi32>
      %cst_40 = arith.constant -0.166666672 : f32
      %cst_41 = arith.constant 0.000000e+00 : f32
      %81 = vector.broadcast %cst_40 : f32 to vector<1x16xf32>
      %82 = vector.broadcast %cst_41 : f32 to vector<1x16xf32>
      %83 = arith.select %80, %81, %82 : vector<1x16xi1>, vector<1x16xf32>
      %cst_42 = arith.constant 2.500000e-01 : f32
      %84 = vector.broadcast %cst_42 : f32 to vector<1x16xf32>
      %85 = arith.select %78, %84, %83 : vector<1x16xi1>, vector<1x16xf32>
      %86 = vector.broadcast %76 : vector<16x1xf32> to vector<16x16xf32>
      %87 = arith.mulf %59, %86 : vector<16x16xf32>
      %88 = vector.broadcast %85 : vector<1x16xf32> to vector<16x16xf32>
      %89 = arith.mulf %87, %88 : vector<16x16xf32>
      %90 = vector.shape_cast %89 : vector<16x16xf32> to vector<1x16x16xf32>
      %cst_43 = arith.constant dense<0.000000e+00> : vector<1xf32>
      %91 = vector.multi_reduction <add>, %90, %cst_43 [1, 2] : vector<1x16x16xf32> to vector<1xf32>
      %92 = vector.shape_cast %91 : vector<1xf32> to vector<1x1x1xf32>
      %93 = vector.extract %92[0, 0, 0] : f32 from vector<1x1x1xf32>
      %cst_44 = arith.constant 2.000000e-01 : f32
      %94 = arith.mulf %93, %cst_44 : f32
      %c0_45 = arith.constant 0 : index
      %c0_46 = arith.constant 0 : index
      %c0_47 = arith.constant 0 : index
      %95 = vector.load %arg8[%c0_45, %c0_46, %c0_47] : memref<1x8x128xf32, #tpu.memory_space<vmem>>, vector<1x8x128xf32>
      %96 = vector.broadcast %94 : f32 to vector<1x8x128xf32>
      %97 = arith.addf %95, %96 : vector<1x8x128xf32>
      %c0_48 = arith.constant 0 : index
      %c0_49 = arith.constant 0 : index
      %c0_50 = arith.constant 0 : index
      %98 = vector.load %arg8[%c0_48, %c0_49, %c0_50] : memref<1x8x128xf32, #tpu.memory_space<vmem>>, vector<1x8x128xf32>
      tpu.vector_store %arg8[%c0_48, %c0_49, %c0_50], %97 {strides = array<i32>} : memref<1x8x128xf32, #tpu.memory_space<vmem>>, vector<1x8x128xf32>,
    } else {
    }
    return
  }
  func.func @transform_0(%arg0: i32, %arg1: i32, %arg2: i32) -> (i32, i32) {
    %c0_i32 = arith.constant 0 : i32
    %c0_i32_0 = arith.constant 0 : i32
    %c0_i32_1 = arith.constant 0 : i32
    return %c0_i32, %c0_i32_0 : i32, i32
  }
  func.func @transform_1(%arg0: i32, %arg1: i32, %arg2: i32) -> (i32, i32) {
    %c0_i32 = arith.constant 0 : i32
    return %arg0, %arg2 : i32, i32
  }
  func.func @transform_2(%arg0: i32, %arg1: i32, %arg2: i32) -> (i32, i32) {
    %c0_i32 = arith.constant 0 : i32
    return %arg2, %arg1 : i32, i32
  }
  func.func @transform_3(%arg0: i32, %arg1: i32, %arg2: i32) -> (i32, i32) {
    %c0_i32 = arith.constant 0 : i32
    %c0_i32_0 = arith.constant 0 : i32
    return %arg0, %c0_i32 : i32, i32
  }
  func.func @transform_4(%arg0: i32, %arg1: i32, %arg2: i32) -> (i32, i32) {
    %c0_i32 = arith.constant 0 : i32
    %c0_i32_0 = arith.constant 0 : i32
    return %c0_i32, %arg1 : i32, i32
  }
  func.func @transform_5(%arg0: i32, %arg1: i32, %arg2: i32) -> (i32, i32, i32) {
    %c0_i32 = arith.constant 0 : i32
    %c0_i32_0 = arith.constant 0 : i32
    %c0_i32_1 = arith.constant 0 : i32
    return %arg0, %c0_i32, %c0_i32_0 : i32, i32, i32
  }
}

</mosaic_0001>

<bundles_post_ra>
// kernel: multi_kernel_mmd_loss.1
= control target key start
LH: loop header
LB: loop body
LE: loop exit
PB: predicated region body
PF: predicated region fallthrough
CT: control target
= control target key end

     0   :  { %v358_v4 = vmov 0   ;;  %s611_s2 = inlined_call_operand.vmem [shape: f32[128,16], index: 2, kind: input, shape index: {}]   ;;  %s612_s0 = inlined_call_operand.<no memory space> [shape: f32[1,1], index: 0, kind: input, shape index: {}]   ;;  %s613_s3 = inlined_call_operand.vmem [shape: f32[16,1], index: 3, kind: input, shape index: {}]   ;;  %s614_s4 = inlined_call_operand.vmem [shape: f32[1,16], index: 4, kind: input, shape index: {}]   ;;  %s615_s1 = inlined_call_operand.vmem [shape: f32[16,128], index: 1, kind: input, shape index: {}]   ;;  %s616_s5 = inlined_call_operand.vmem [shape: f32[1,8,128], index: 5, kind: output, shape index: {}]  }
   0x1   :  { %v53_v0 = vld [vmem:[%s611_s2 + $0x78] sm:$0xff]  ;;  %v52_v1 = vld [vmem:[%s611_s2 + $0x70] sm:$0xff]  ;;  %v400_v2 = vstv %s612_s0  ;;  %s138_s26 = smul.f32 2.0, %s612_s0  ;;  %v51_v3 = vld [vmem:[%s611_s2 + $0x68] sm:$0xff]  ;;  %326 = vset.pattern.permute.xlu0 %v358_v4 }
   0x2   :  { %54 = vmatpush.msra.mxu0 %v53_v0  ;;  %295 = vmatpush.msra.mxu1 %v53_v0  ;;  %328 = vrcp.f32 %v400_v2  ;;  %s165_s6 = smul.f32 4.0, %s612_s0  ;;  %v50_v6 = vld [vmem:[%s611_s2 + $0x60] sm:$0xff]  ;;  %v122_v7 = vand.u32 2147483647, %v400_v2  ;;  %v124_v9 = vand.u32 2147483648, %v400_v2  ;;  %v49_v10 = vld [vmem:[%s611_s2 + $0x58] sm:$0xff]  ;;  %vm118_vm0 = vweird.f32 %v400_v2 }
   0x3   :  { %v409_v5 = vstv %s138_s26  ;;  %s192_s9 = smul.f32 8.0, %s612_s0  ;;  %v85_v11 = vld [vmem:[%s613_s3] sm:$0xff]  ;;  %v48_v14 = vld [vmem:[%s611_s2 + $0x50] sm:$0xff]  ;;  %v47_v21 = vld [vmem:[%s611_s2 + $0x48] sm:$0xff] }
   0x4   :  { %55 = vmatpush.msra.mxu0 %v52_v1  ;;  %296 = vmatpush.msra.mxu1 %v52_v1  ;;  %330 = vrcp.f32 %v409_v5  ;;  %v422_v8 = vstv %s165_s6  ;;  %s219_s18 = smul.f32 16.0, %s612_s0  ;;  %vm446_vm1 = vcmp.eq.f32.partialorder %v122_v7, 8.507059e+37  ;;  %v125_v18 = vor.u32 1.1754944e-38, %v124_v9  ;;  %v46_v28 = vld [vmem:[%s611_s2 + $0x40] sm:$0xff]  ;;  %v86_v33 = vld [vmem:[%s613_s3 + $0x8] sm:$0xff]  ;;  %v45_v38 = vld [vmem:[%s611_s2 + $0x38] sm:$0xff] }
   0x5   :  { %332 = vrcp.f32 %v422_v8  ;;  %v432_v12 = vstv %s192_s9  ;;  %90 = vperm.xlu0 %326, %v85_v11   ;;  %vm145_vm2 = vweird.f32 %v409_v5  ;;  %v149_v19 = vand.u32 2147483647, %v409_v5  ;;  %v44_v46 = vld [vmem:[%s611_s2 + $0x30] sm:$0xff]  ;;  %v43_v57 = vld [vmem:[%s611_s2 + $0x28] sm:$0xff]  ;;  %v41_v7 = vld [vmem:[%s611_s2 + $0x18] sm:$0xff] }
   0x6   :  { %56 = vmatpush.msra.mxu0 %v51_v3  ;;  %297 = vmatpush.msra.mxu1 %v51_v3  ;;  %334 = vrcp.f32 %v432_v12  ;;  %v454_v20 = vstv %s219_s18  ;;  %v151_v24 = vand.u32 2147483648, %v409_v5  ;;  %vm172_vm4 = vweird.f32 %v422_v8 }
   0x7   :  { %v176_v26 = vand.u32 2147483647, %v422_v8  ;;  %v178_v27 = vand.u32 2147483648, %v422_v8  ;;  %336 = vrcp.f32 %v454_v20  ;;  %vm489_vm7 = vcmp.eq.f32.partialorder %v149_v19, 8.507059e+37  ;;  %v37_v19 = vld [vmem:[%s615_s1 + $0x8] sm:$0xff] }
   0x8   :  { %v437_v13 = vpop.eup %328  ;;  %57 = vmatpush.msra.mxu0 %v50_v6  ;;  %298 = vmatpush.msra.mxu1 %v50_v6  ;;  %v203_v36 = vand.u32 2147483647, %v432_v12  ;;  %v205_v37 = vand.u32 2147483648, %v432_v12  ;;  %v152_v44 = vor.u32 1.1754944e-38, %v151_v24  ;;  %vm199_vm11 = vweird.f32 %v432_v12 }
   0x9   :  { %v114_v15 = vmul.f32 %v437_v13, %v400_v2  ;;  %vm119_vm3 = vweird.f32 %v437_v13  ;;  %vm511_vm10 = vcmp.eq.f32.partialorder %v176_v26, 8.507059e+37  ;;  %v179_v54 = vor.u32 1.1754944e-38, %v178_v27  ;;  %v42_v2 = vld [vmem:[%s611_s2 + $0x20] sm:$0xff] }
   0xa   :  { %v450_v17 = vpop.eup %330  ;;  %58 = vmatpush.msra.mxu0 %v49_v10  ;;  %299 = vmatpush.msra.mxu1 %v49_v10  ;;  %vm485_vm6 = vmor %vm118_vm0, %vm119_vm3  ;;  %vm535_vm14 = vcmp.eq.f32.partialorder %v203_v36, 8.507059e+37  ;;  %v206_v56 = vor.u32 1.1754944e-38, %v205_v37  ;;  %vm226_vm0 = vweird.f32 %v454_v20  ;;  %v230_v0 = vand.u32 2147483647, %v454_v20 }
   0xb   :  { %v115_v22 = vsub.f32 1.0, %v114_v15  ;;  %v141_v23 = vmul.f32 %v450_v17, %v409_v5  ;;  %v463_v25 = vpop.eup %332  ;;  %vm146_vm5 = vweird.f32 %v450_v17  ;;  %v232_v1 = vand.u32 2147483648, %v454_v20 }
   0xc   :  { %59 = vmatpush.msra.mxu0 %v48_v14  ;;  %300 = vmatpush.msra.mxu1 %v48_v14  ;;  %v168_v31 = vmul.f32 %v463_v25, %v422_v8  ;;  %v476_v32 = vpop.eup %334  ;;  %vm173_vm8 = vweird.f32 %v463_v25  ;;  %vm507_vm9 = vmor %vm145_vm2, %vm146_vm5  ;;  %vm231_vm3 = vcmp.eq.f32.partialorder %v230_v0, 8.507059e+37  ;;  %v39_v14 = vld [vmem:[%s611_s2 + $0x8] sm:$0xff] }
   0xd   :  { %v116_v29 = vmul.f32 %v437_v13, %v115_v22  ;;  %v142_v30 = vsub.f32 1.0, %v141_v23  ;;  %v195_v42 = vmul.f32 %v476_v32, %v432_v12  ;;  %vm200_vm12 = vweird.f32 %v476_v32  ;;  %95 = vperm.xlu0 %326, %v86_v33   ;;  %v337_v51 = vpop.eup %336  ;;  %vm531_vm13 = vmor %vm172_vm4, %vm173_vm8  ;;  %v40_v12 = vld [vmem:[%s611_s2 + $0x10] sm:$0xff] }
   0xe   :  { %60 = vmatpush.msra.mxu0 %v47_v21  ;;  %301 = vmatpush.msra.mxu1 %v47_v21  ;;  %v169_v41 = vsub.f32 1.0, %v168_v31  ;;  %v222_v61 = vmul.f32 %v337_v51, %v454_v20  ;;  %vm554_vm15 = vmor %vm199_vm11, %vm200_vm12  ;;  %v233_v11 = vor.u32 1.1754944e-38, %v232_v1  ;;  %vm31_vm4 = vcmask 130048  }
   0xf   :  { %v117_v39 = vadd.f32 %v437_v13, %v116_v29  ;;  %v143_v40 = vmul.f32 %v450_v17, %v142_v30  ;;  %v196_v50 = vsub.f32 1.0, %v195_v42  ;;  %v359_v20 = vmov 0.0  }
  0x10   :  { %61 = vmatpush.msra.mxu0 %v46_v28  ;;  %302 = vmatpush.msra.mxu1 %v46_v28  ;;  %v170_v49 = vmul.f32 %v463_v25, %v169_v41  ;;  %v223_v5 = vsub.f32 1.0, %v222_v61  ;;  %32 = vst.msk [vmem:[#allocation2] sm:$0xff] %vm31_vm4, %v359_v20  ;;  %v327_v28 = vld [vmem:[%s614_s4] ss:$0 sm:$0xff] }
  0x11   :  { %v121_v47 = vsel %vm485_vm6, %v437_v13, %v117_v39  ;;  %v144_v48 = vadd.f32 %v450_v17, %v143_v40  ;;  %v197_v60 = vmul.f32 %v476_v32, %v196_v50  ;;  %33 = vst.msk [vmem:[#allocation2 + $0x8] sm:$0xff] %vm31_vm4, %v359_v20 }
  0x12   :  { %62 = vmatpush.msra.mxu0 %v45_v38  ;;  %303 = vmatpush.msra.mxu1 %v45_v38  ;;  %v126_v52 = vsel %vm446_vm1, %v125_v18, %v121_v47  ;;  %v171_v59 = vadd.f32 %v463_v25, %v170_v49  ;;  %vm227_vm1 = vweird.f32 %v337_v51  ;;  %v224_v9 = vmul.f32 %v337_v51, %v223_v5  ;;  %v36_v18 = vld [vmem:[%s615_s1] sm:$0xff] }
  0x13   :  { %311 = vpush %v126_v52  ;;  %v148_v58 = vsel %vm507_vm9, %v450_v17, %v144_v48  ;;  %v198_v4 = vadd.f32 %v476_v32, %v197_v60  ;;  %vm228_vm2 = vmor %vm226_vm0, %vm227_vm1  ;;  %v38_v17 = vld [vmem:[%s611_s2] sm:$0xff] }
  0x14   :  { %63 = vmatpush.msra.mxu0 %v44_v46  ;;  %304 = vmatpush.msra.mxu1 %v44_v46  ;;  %v153_v62 = vsel %vm489_vm7, %v152_v44, %v148_v58  ;;  %v175_v3 = vsel %vm531_vm13, %v463_v25, %v171_v59  ;;  %v225_v13 = vadd.f32 %v337_v51, %v224_v9  ;;  %v247_v59 = vlaneseq }
  0x15   :  { %313 = vpush %v153_v62  ;;  %v180_v6 = vsel %vm511_vm10, %v179_v54, %v175_v3  ;;  %v202_v8 = vsel %vm554_vm15, %v476_v32, %v198_v4 }
  0x16   :  { %64 = vmatpush.msra.mxu0 %v43_v57  ;;  %305 = vmatpush.msra.mxu1 %v43_v57  ;;  %315 = vpush %v180_v6  ;;  %v207_v10 = vsel %vm535_vm14, %v206_v56, %v202_v8  ;;  %v229_v15 = vsel %vm228_vm2, %v337_v51, %v225_v13  ;;  %v248_v1 = vshrl.u32 %v247_v59, 7  ;;  %v255_v4 = vand.u32 127, %v247_v59 }
  0x17   :  { %317 = vpush %v207_v10  ;;  %v234_v16 = vsel %vm231_vm3, %v233_v11, %v229_v15  ;;  %v34_v21 = vld [vmem:[#allocation2] sm:$0xff] }
  0x18   :  { %65 = vmatpush.msra.mxu0 %v42_v2  ;;  %306 = vmatpush.msra.mxu1 %v42_v2  ;;  %319 = vpush %v234_v16  ;;  %v35_v22 = vld [vmem:[#allocation2 + $0x8] sm:$0xff]  ;;  %vm267_vm5 = vcmp.lt.s32.totalorder %v255_v4, 10  ;;  %vm258_vm6 = vcmp.lt.s32.totalorder %v248_v1, 4  ;;  %vm266_vm8 = vcmp.lt.s32.totalorder %v255_v4, 4 }
  0x1a   :  { %66 = vmatpush.msra.mxu0 %v41_v7  ;;  %307 = vmatpush.msra.mxu1 %v41_v7  ;;  %v249_v7 = vadd.s32 8, %v248_v1 }
  0x1c   :  { %67 = vmatpush.msra.mxu0 %v40_v12  ;;  %308 = vmatpush.msra.mxu1 %v40_v12  ;;  %vm261_vm7 = vcmp.lt.s32.totalorder %v249_v7, 10 }
  0x1e   :  { %68 = vmatpush.msra.mxu0 %v39_v14  ;;  %309 = vmatpush.msra.mxu1 %v39_v14 }
  0x20   :  { %69 = vmatpush.msra.mxu0 %v38_v17  ;;  %310 = vmatpush.msra.mxu1 %v38_v17 }
  0x21   :  { %70 = vmatmul.f32.vlgmr.msra.gmra.mxu0 %v36_v18  ;;  %73 = vmatmul.f32.vlgmr.msra.gmra.mxu1 %v37_v19  ;;  %v268_v18 = vsel %vm267_vm5, -0.16666667, %v359_v20 }
  0x44   :  { %s312_s1 = spop %311 }
  0x45   :  { %s128_s22 = smul.f32 -1.0, %s312_s1 }
  0x46   :  { %s314_s2 = spop %313 }
  0x47   :  { %s316_s21 = spop %315  ;;  %s155_s23 = smul.f32 -1.0, %s314_s2  ;;  %v129_v38 = vstv %s128_s22 }
  0x48   :  { %s318_s24 = spop %317  ;;  %s182_s25 = smul.f32 -1.0, %s316_s21 }
  0x49   :  { %s320_s26 = spop %319  ;;  %s209_s3 = smul.f32 -1.0, %s318_s24  ;;  %v156_v39 = vstv %s155_s23 }
  0x4a   :  { %v183_v40 = vstv %s182_s25  ;;  %s236_s4 = smul.f32 -1.0, %s320_s26 }
  0x4b   :  { %v210_v43 = vstv %s209_s3 }
  0x4c   :  { %v237_v50 = vstv %s236_s4 }
  0x77   :  { %v91_v23 = vpop.permute.xlu0 %90 }
  0x78   :  { %v101_v31 = vadd.f32 %v327_v28, %v91_v23 }
  0x7f   :  { %v96_v29 = vpop.permute.xlu0 %95 }
  0x80   :  { %v102_v34 = vadd.f32 %v327_v28, %v96_v29  ;;  %v269_v28 = vsel %vm266_vm8, 0.25, %v268_v18 }
  0x9e   :  { %v71_v24 = vpop.f32.mrf.mxu0  ;;  %v74_v25 = vpop.f32.mrf.mxu1 }
  0x9f   :  { %v77_v26 = vadd.f32 %v71_v24, %v34_v21  ;;  %v78_v27 = vadd.f32 %v74_v25, %v35_v22  ;;  %v360_v22 = vmov -0.16666667  }
  0xa0   :  { %v264_v23 = vsel %vm258_vm6, 0.25, %v360_v22 }
  0xa1   :  { %80 = vst.msk [vmem:[#allocation2] sm:$0xff] %vm31_vm4, %v77_v26  ;;  %v263_v26 = vsel %vm261_vm7, -0.16666667, %v359_v20 }
  0xa2   :  { %81 = vst.msk [vmem:[#allocation2 + $0x8] sm:$0xff] %vm31_vm4, %v78_v27 }
  0xa8   :  { %v103_v30 = vld [vmem:[#allocation2] sm:$0xff] }
  0xa9   :  { %v104_v32 = vld [vmem:[#allocation2 + $0x8] sm:$0xff]  ;;  %v105_v33 = vmul.f32 2.0, %v103_v30 }
  0xaa   :  { %v106_v35 = vmul.f32 2.0, %v104_v32 }
  0xab   :  { %v107_v36 = vsub.f32 %v101_v31, %v105_v33 }
  0xac   :  { %v108_v37 = vsub.f32 %v102_v34, %v106_v35 }
  0xad   :  { %v109_v41 = vmax.f32 %v107_v36, 0.0 }
  0xae   :  { %v110_v42 = vmax.f32 %v108_v37, 0.0 }
  0xaf   :  { %v130_v44 = vmul.f32 %v129_v38, %v109_v41  ;;  %v157_v45 = vmul.f32 %v156_v39, %v109_v41  ;;  %v184_v46 = vmul.f32 %v183_v40, %v109_v41  ;;  %v211_v53 = vmul.f32 %v210_v43, %v109_v41 }
  0xb0   :  { %v131_v47 = vmul.f32 %v129_v38, %v110_v42  ;;  %v158_v48 = vmul.f32 %v156_v39, %v110_v42  ;;  %v185_v49 = vmul.f32 %v183_v40, %v110_v42  ;;  %v212_v56 = vmul.f32 %v210_v43, %v110_v42 }
  0xb1   :  { %v132_v51 = vmul.f32 1.442695, %v130_v44  ;;  %v159_v52 = vmul.f32 1.442695, %v157_v45  ;;  %v186_v57 = vmul.f32 1.442695, %v184_v46  ;;  %v238_v58 = vmul.f32 %v237_v50, %v109_v41 }
  0xb2   :  { %v134_v54 = vmul.f32 1.442695, %v131_v47  ;;  %v161_v55 = vmul.f32 1.442695, %v158_v48  ;;  %v188_v60 = vmul.f32 1.442695, %v185_v49  ;;  %v239_v61 = vmul.f32 %v237_v50, %v110_v42 }
  0xb3   :  { %338 = vpow2.f32 %v132_v51  ;;  %v213_v62 = vmul.f32 1.442695, %v211_v53  ;;  %v215_v63 = vmul.f32 1.442695, %v212_v56  ;;  %v240_v0 = vmul.f32 1.442695, %v238_v58 }
  0xb4   :  { %340 = vpow2.f32 %v134_v54  ;;  %v242_v2 = vmul.f32 1.442695, %v239_v61 }
  0xb5   :  { %342 = vpow2.f32 %v159_v52 }
  0xb6   :  { %344 = vpow2.f32 %v161_v55 }
  0xb7   :  { %346 = vpow2.f32 %v186_v57 }
  0xb8   :  { %348 = vpow2.f32 %v188_v60 }
  0xb9   :  { %v339_v3 = vpop.eup %338  ;;  %350 = vpow2.f32 %v213_v62 }
  0xba   :  { %v341_v5 = vpop.eup %340  ;;  %352 = vpow2.f32 %v215_v63 }
  0xbb   :  { %v343_v6 = vpop.eup %342  ;;  %354 = vpow2.f32 %v240_v0 }
  0xbc   :  { %v345_v8 = vpop.eup %344  ;;  %v163_v9 = vadd.f32 %v343_v6, %v339_v3  ;;  %356 = vpow2.f32 %v242_v2 }
  0xbd   :  { %v347_v10 = vpop.eup %346  ;;  %v164_v11 = vadd.f32 %v345_v8, %v341_v5 }
  0xbe   :  { %v349_v12 = vpop.eup %348  ;;  %v190_v13 = vadd.f32 %v347_v10, %v163_v9 }
  0xbf   :  { %v351_v14 = vpop.eup %350  ;;  %v191_v15 = vadd.f32 %v349_v12, %v164_v11 }
  0xc0   :  { %v353_v16 = vpop.eup %352  ;;  %v217_v17 = vadd.f32 %v351_v14, %v190_v13 }
  0xc1   :  { %v355_v19 = vpop.eup %354  ;;  %v218_v21 = vadd.f32 %v353_v16, %v191_v15 }
  0xc2   :  { %v357_v24 = vpop.eup %356  ;;  %v244_v25 = vadd.f32 %v355_v19, %v217_v17 }
  0xc3   :  { %v245_v27 = vadd.f32 %v357_v24, %v218_v21 }
  0xc4   :  { %v270_v29 = vmul.f32 %v264_v23, %v244_v25 }
  0xc5   :  { %v271_v30 = vmul.f32 %v263_v26, %v245_v27 }
  0xc6   :  { %v272_v31 = vmul.f32 %v270_v29, %v269_v28 }
  0xc7   :  { %v273_v32 = vmul.f32 %v271_v30, %v269_v28 }
  0xc8   :  { %v274_v33 = vsel %vm31_vm4, %v272_v31, 0.0 }
  0xc9   :  { %v275_v34 = vsel %vm31_vm4, %v273_v32, 0.0 }
  0xca   :  { %v276_v35 = vadd.f32 %v275_v34, %v274_v33 }
  0xcc   :  { %277 = vadd.xlane.f32.xlu1 %v276_v35 }
 0x13f   :  { %v278_v36 = vpop.xlane.xlu1 %277 }
 0x140   :  { %v279_v37 = vrot.slane %v278_v36, 4 }
 0x142   :  { %v280_v38 = vadd.f32 %v279_v37, %v278_v36 }
 0x144   :  { %v281_v39 = vrot.slane %v280_v38, 2 }
 0x146   :  { %v282_v40 = vadd.f32 %v281_v39, %v280_v38 }
 0x148   :  { %v283_v41 = vrot.slane %v282_v40, 1 }
 0x14a   :  { %v284_v42 = vadd.f32 %v283_v41, %v282_v40 }
 0x14c   :  { %321 = vpush %v284_v42 }
 0x17d   :  { %s322_s27 = spop %321 }
 0x17e   :  { %s286_s28 = smul.f32 0.2, %s322_s27 }
 0x180   :  { %v288_v20 = vstv %s286_s28 }
 0x181   :  { %290 = vst [vmem:[%s616_s5] sm:$0xff] %v288_v20 }

</bundles_post_ra>
